<compile_context>
chip_gen: v6e
topology: v6e:2x2x1
jax: 0.10.0
libtpu: 0.0.40
codegen_flags: <defaults>
</compile_context>

<pallas_src>
import functools

import numpy as np
import jax
import jax.numpy as jnp
from jax.experimental import pallas as pl
from jax.experimental.pallas import tpu as pltpu

_LANE = 128


def _round_up(n, m):
    return (n + m - 1) // m * m


def _cdiv(a, b):
    return -(-a // b)


@functools.lru_cache(maxsize=None)
def _make_classifierx_kernel(num_hidden, compute_dtype_name):
    compute_dtype = np.dtype(compute_dtype_name)

    def kernel(x_ref, *refs):
        out_ref = refs[-1]
        wb = refs[:-1]                       # (w, b) per hidden layer + output layer

        h = x_ref[...]                       # (TM, D_in), already compute dtype
        for i in range(num_hidden):
            w = wb[2 * i][...]               # (D_prev, H_i_pad) compute dtype
            b = wb[2 * i + 1][...]           # (1, H_i_pad) f32
            acc = jnp.dot(h, w, preferred_element_type=jnp.float32) + b
            # Fused ReLU + demotion; padded columns (zero weights & bias) stay 0.
            h = jnp.maximum(acc, 0.0).astype(compute_dtype)

        wo = wb[2 * num_hidden][...]         # (H_last_pad, O) compute dtype
        bo = wb[2 * num_hidden + 1][...]     # (1, O) f32
        logits = jnp.dot(h, wo, preferred_element_type=jnp.float32) + bo

        # Numerically stable row softmax over the (unpadded) class dim.
        m = jnp.max(logits, axis=-1, keepdims=True)
        p = jnp.exp(logits - m)
        denom = jnp.sum(p, axis=-1, keepdims=True)
        # Exact division: rows sum to 1 within f32 rounding (approx reciprocal
        # was the cause of the previous row-sum failure).
        out_ref[...] = (p / denom).astype(out_ref.dtype)

    return kernel


def prepare_params(params, compute_dtype=jnp.bfloat16, lane_multiple=_LANE):
    """One-time prep, hoisted off the per-call path.

    * Weights transposed to (in, out).
    * Hidden output widths zero-padded to a lane multiple (128; choose 256 on
      v6e/v7x when widths are a free design choice) so per-layer activations are
      lane-dense. Input-feature and class dims stay unpadded, so no per-call
      jnp.pad of x and no padded-logit masking is needed.
    * Weights cast once to the MXU compute dtype (bf16 native on v5e/v6e/v7x);
      biases kept f32 (they add into the f32 accumulator).

    params = {"hidden": [(w, b), ...], "out": (w, b)} with PyTorch-convention
    weights of shape (out_features, in_features).
    """
    hidden = params["hidden"]
    wo, bo = params["out"]
    in_size = hidden[0][0].shape[1]
    out_size = wo.shape[0]
    cdt = np.dtype(compute_dtype)

    flat = []
    prev_width = in_size                      # width of activation feeding next layer
    for (w, b) in hidden:
        out_f, in_f = w.shape
        out_p = _round_up(out_f, lane_multiple)
        w_t = (jnp.zeros((prev_width, out_p), jnp.float32)
               .at[:in_f, :out_f].set(jnp.asarray(w, jnp.float32).T))
        b_p = (jnp.zeros((1, out_p), jnp.float32)
               .at[0, :out_f].set(jnp.asarray(b, jnp.float32)))
        flat += [w_t.astype(cdt), b_p]
        prev_width = out_p

    # Output layer: pad only the in-dim (to match the padded last activation);
    # the class dim stays unpadded -> no write-back amplification, no slice.
    out_f, in_f = wo.shape
    w_t = (jnp.zeros((prev_width, out_f), jnp.float32)
           .at[:in_f, :].set(jnp.asarray(wo, jnp.float32).T))
    b_p = jnp.asarray(bo, jnp.float32).reshape(1, out_f)
    flat += [w_t.astype(cdt), b_p]

    return {
        "flat": tuple(flat),
        "num_hidden": len(hidden),
        "in_size": in_size,
        "out_size": out_size,
        "compute_dtype": cdt.name,
    }


@functools.partial(jax.jit,
                   static_argnames=("num_hidden", "out_size", "compute_dtype", "block_m"))
def _forward_impl(x, flat, *, num_hidden, out_size, compute_dtype, block_m):
    cdt = np.dtype(compute_dtype)
    B, d_in = x.shape
    if x.dtype != cdt:
        x = x.astype(cdt)                    # one wrapper-side cast -> halves x-tile DMA

    # Batch tile: 16-row aligned for packed bf16 sublanes (8 for f32). For
    # batches big enough to split, force >= 2 grid steps so both v7x TCs get work.
    align = 16 if cdt.itemsize == 2 else 8
    if B >= 2 * align:
        tm = min(_round_up(block_m, align), _round_up(_cdiv(B, 2), align))
    else:
        tm = B                               # single full-extent tile (always legal)
    grid = (_cdiv(B, tm),)                   # partial last tile: garbage rows are
                                             # row-independent and masked on store.

    x_spec = pl.BlockSpec((tm, d_in), lambda i: (i, 0))
    # Weights/biases: full-array blocks, constant index_map (VMEM-resident across
    # the whole batch grid), single-buffered (invariant blocks need no double buffer).
    resident_specs = [
        pl.BlockSpec(arr.shape, lambda i: (0, 0), pipeline_mode=pl.Buffered(1))
        for arr in flat
    ]
    out_spec = pl.BlockSpec((tm, out_size), lambda i: (i, 0))

    # Explicit VMEM budget: resident params (x1 buffer) + double-buffered x/out
    # tiles + f32 accumulator + compute-dtype activation slab, +30% headroom.
    param_bytes = sum(int(a.size) * a.dtype.itemsize for a in flat)
    widths = [d_in] + [flat[2 * i].shape[1] for i in range(num_hidden)] + [out_size]
    io_bytes = 2 * (tm * d_in * cdt.itemsize + tm * out_size * 4)
    act_bytes = tm * max(widths) * (4 + cdt.itemsize)
    vmem_limit = int(1.3 * (param_bytes + io_bytes + act_bytes)) + (2 << 20)
    vmem_limit = min(max(vmem_limit, 16 << 20), 56 << 20)   # stay under v7x 64 MiB/TC

    kernel = _make_classifierx_kernel(num_hidden, compute_dtype)
    return pl.pallas_call(
        kernel,
        out_shape=jax.ShapeDtypeStruct((B, out_size), jnp.float32),
        grid=grid,
        in_specs=[x_spec] + resident_specs,
        out_specs=out_spec,
        compiler_params=pltpu.CompilerParams(
            dimension_semantics=("parallel",),
            vmem_limit_bytes=vmem_limit,
        ),
    )(x, *flat)


def classifierx_forward(x, prepped, *, block_m=512):
    """x: (batch, inputSize). Returns softmax probabilities (batch, outputSize), f32."""
    assert x.shape[1] == prepped["in_size"], "input feature size mismatch"
    return _forward_impl(
        x, prepped["flat"],
        num_hidden=prepped["num_hidden"],
        out_size=prepped["out_size"],
        compute_dtype=prepped["compute_dtype"],
        block_m=block_m,
    )


def init_params(key, input_size, hidden_sizes, output_size):
    """Deterministic synthetic init mimicking nn.Linear's U(-1/sqrt(in), 1/sqrt(in))."""
    sizes = [input_size] + list(hidden_sizes)
    keys = jax.random.split(key, 2 * (len(hidden_sizes) + 1))

    def lin(kw, kb, fan_in, fan_out):
        bound = 1.0 / jnp.sqrt(fan_in)
        w = jax.random.uniform(kw, (fan_out, fan_in), jnp.float32, -bound, bound)
        b = jax.random.uniform(kb, (fan_out,), jnp.float32, -bound, bound)
        return w, b

    hidden = []
    for i in range(len(hidden_sizes)):
        hidden.append(lin(keys[2 * i], keys[2 * i + 1], sizes[i], sizes[i + 1]))
    out = lin(keys[-2], keys[-1], hidden_sizes[-1], output_size)
    return {"hidden": hidden, "out": out}


def _reference(x, params):
    """Pure-JAX f32 reference identical to the PyTorch forward."""
    h = x
    for (w, b) in params["hidden"]:
        h = jax.nn.relu(h @ w.T + b)
    wo, bo = params["out"]
    return jax.nn.softmax(h @ wo.T + bo, axis=1)


if __name__ == "__main__":
    # Small shapes consistent with the module's forward.
    batch = 16
    input_size = 16
    hidden_sizes = [32, 32]
    output_size = 4

    key = jax.random.PRNGKey(0)
    kx, kp = jax.random.split(key)
    x = jax.random.normal(kx, (batch, input_size), jnp.float32)
    params = init_params(kp, input_size, hidden_sizes, output_size)

    # One-time parameter prep: transpose, lane-pad hidden widths, cast to bf16
    # (MXU-native on v5e/v6e/v7x). Biases stay f32; accumulation/softmax are f32.
    prepped = prepare_params(params, compute_dtype=jnp.bfloat16)

    out = classifierx_forward(x, prepped)
    out = jax.block_until_ready(out)

    ref = _reference(x, params)
    assert out.shape == (batch, output_size)
    # Exact-division softmax: rows sum to 1 within f32 rounding.
    assert jnp.allclose(jnp.sum(out, axis=1), 1.0, atol=1e-3), "softmax rows must sum to 1"
    # bf16 matmul operands (f32 accumulation) vs f32 reference.
    assert jnp.allclose(out, ref, atol=3e-2, rtol=3e-2), "mismatch vs reference"

    print("KERNEL_OK")
</pallas_src>

<mosaic_0001>
module attributes {stable_mosaic.version = 11 : i64} {
  func.func @kernel(%arg0: i32, %arg1: memref<16x16xbf16, #tpu.memory_space<vmem>>, %arg2: memref<16x128xbf16, #tpu.memory_space<vmem>>, %arg3: memref<1x128xf32, #tpu.memory_space<vmem>>, %arg4: memref<128x128xbf16, #tpu.memory_space<vmem>>, %arg5: memref<1x128xf32, #tpu.memory_space<vmem>>, %arg6: memref<128x4xbf16, #tpu.memory_space<vmem>>, %arg7: memref<1x4xf32, #tpu.memory_space<vmem>>, %arg8: memref<16x4xf32, #tpu.memory_space<vmem>>) attributes {dimension_semantics = [#tpu.dimension_semantics<parallel>], iteration_bounds = array<i64: 1>, scalar_prefetch = 0 : i64, scratch_operands = 0 : i64, tpu.core_type = #tpu.core_type<tc>, window_params = [{transform_indices = @transform_0, window_bounds = array<i64: 16, 16>}, {pipeline_mode = #tpu.pipeline_mode<synchronous>, transform_indices = @transform_1, window_bounds = array<i64: 16, 128>}, {pipeline_mode = #tpu.pipeline_mode<synchronous>, transform_indices = @transform_2, window_bounds = array<i64: 1, 128>}, {pipeline_mode = #tpu.pipeline_mode<synchronous>, transform_indices = @transform_3, window_bounds = array<i64: 128, 128>}, {pipeline_mode = #tpu.pipeline_mode<synchronous>, transform_indices = @transform_4, window_bounds = array<i64: 1, 128>}, {pipeline_mode = #tpu.pipeline_mode<synchronous>, transform_indices = @transform_5, window_bounds = array<i64: 128, 4>}, {pipeline_mode = #tpu.pipeline_mode<synchronous>, transform_indices = @transform_6, window_bounds = array<i64: 1, 4>}, {transform_indices = @transform_7, window_bounds = array<i64: 16, 4>}]} {
    %c0 = arith.constant 0 : index
    %c0_0 = arith.constant 0 : index
    %0 = vector.load %arg1[%c0, %c0_0] : memref<16x16xbf16, #tpu.memory_space<vmem>>, vector<16x16xbf16>
    %c0_1 = arith.constant 0 : index
    %c0_2 = arith.constant 0 : index
    %1 = vector.load %arg2[%c0_1, %c0_2] : memref<16x128xbf16, #tpu.memory_space<vmem>>, vector<16x128xbf16>
    %c0_3 = arith.constant 0 : index
    %c0_4 = arith.constant 0 : index
    %2 = vector.load %arg3[%c0_3, %c0_4] : memref<1x128xf32, #tpu.memory_space<vmem>>, vector<1x128xf32>
    %cst = arith.constant dense<0.000000e+00> : vector<16x128xf32>
    %3 = tpu.matmul %0, %1, %cst {dimension_numbers = #tpu.dot_dimension_numbers<[1], [0], [0], [1], [0, 0, 1, 1], [], []>} : vector<16x16xbf16>, vector<16x128xbf16>, vector<16x128xf32> -> vector<16x128xf32>
    %4 = vector.broadcast %2 : vector<1x128xf32> to vector<16x128xf32>
    %5 = arith.addf %3, %4 : vector<16x128xf32>
    %cst_5 = arith.constant 0.000000e+00 : f32
    %6 = vector.broadcast %cst_5 : f32 to vector<16x128xf32>
    %7 = arith.maximumf %5, %6 : vector<16x128xf32>
    %8 = arith.truncf %7 : vector<16x128xf32> to vector<16x128xbf16>
    %c0_6 = arith.constant 0 : index
    %c0_7 = arith.constant 0 : index
    %9 = vector.load %arg4[%c0_6, %c0_7] : memref<128x128xbf16, #tpu.memory_space<vmem>>, vector<128x128xbf16>
    %c0_8 = arith.constant 0 : index
    %c0_9 = arith.constant 0 : index
    %10 = vector.load %arg5[%c0_8, %c0_9] : memref<1x128xf32, #tpu.memory_space<vmem>>, vector<1x128xf32>
    %cst_10 = arith.constant dense<0.000000e+00> : vector<16x128xf32>
    %11 = tpu.matmul %8, %9, %cst_10 {dimension_numbers = #tpu.dot_dimension_numbers<[1], [0], [0], [1], [0, 0, 1, 1], [], []>} : vector<16x128xbf16>, vector<128x128xbf16>, vector<16x128xf32> -> vector<16x128xf32>
    %12 = vector.broadcast %10 : vector<1x128xf32> to vector<16x128xf32>
    %13 = arith.addf %11, %12 : vector<16x128xf32>
    %cst_11 = arith.constant 0.000000e+00 : f32
    %14 = vector.broadcast %cst_11 : f32 to vector<16x128xf32>
    %15 = arith.maximumf %13, %14 : vector<16x128xf32>
    %16 = arith.truncf %15 : vector<16x128xf32> to vector<16x128xbf16>
    %c0_12 = arith.constant 0 : index
    %c0_13 = arith.constant 0 : index
    %17 = vector.load %arg6[%c0_12, %c0_13] : memref<128x4xbf16, #tpu.memory_space<vmem>>, vector<128x4xbf16>
    %c0_14 = arith.constant 0 : index
    %c0_15 = arith.constant 0 : index
    %18 = vector.load %arg7[%c0_14, %c0_15] : memref<1x4xf32, #tpu.memory_space<vmem>>, vector<1x4xf32>
    %cst_16 = arith.constant dense<0.000000e+00> : vector<16x4xf32>
    %19 = tpu.matmul %16, %17, %cst_16 {dimension_numbers = #tpu.dot_dimension_numbers<[1], [0], [0], [1], [0, 0, 1, 1], [], []>} : vector<16x128xbf16>, vector<128x4xbf16>, vector<16x4xf32> -> vector<16x4xf32>
    %20 = vector.broadcast %18 : vector<1x4xf32> to vector<16x4xf32>
    %21 = arith.addf %19, %20 : vector<16x4xf32>
    %cst_17 = arith.constant dense<0xFF800000> : vector<16xf32>
    %22 = vector.multi_reduction <maximumf>, %21, %cst_17 [1] : vector<16x4xf32> to vector<16xf32>
    %23 = vector.shape_cast %22 : vector<16xf32> to vector<16x1xf32>
    %24 = vector.broadcast %23 : vector<16x1xf32> to vector<16x4xf32>
    %25 = arith.subf %21, %24 : vector<16x4xf32>
    %26 = math.exp %25 : vector<16x4xf32>
    %cst_18 = arith.constant dense<0.000000e+00> : vector<16xf32>
    %27 = vector.multi_reduction <add>, %26, %cst_18 [1] : vector<16x4xf32> to vector<16xf32>
    %28 = vector.shape_cast %27 : vector<16xf32> to vector<16x1xf32>
    %29 = vector.broadcast %28 : vector<16x1xf32> to vector<16x4xf32>
    %30 = arith.divf %26, %29 : vector<16x4xf32>
    %c0_19 = arith.constant 0 : index
    %c0_20 = arith.constant 0 : index
    %31 = vector.load %arg8[%c0_19, %c0_20] : memref<16x4xf32, #tpu.memory_space<vmem>>, vector<16x4xf32>
    tpu.vector_store %arg8[%c0_19, %c0_20], %30 {strides = array<i32>} : memref<16x4xf32, #tpu.memory_space<vmem>>, vector<16x4xf32>,
    return
  }
  func.func @transform_0(%arg0: i32) -> (i32, i32) {
    %c0_i32 = arith.constant 0 : i32
    %c0_i32_0 = arith.constant 0 : i32
    return %arg0, %c0_i32 : i32, i32
  }
  func.func @transform_1(%arg0: i32) -> (i32, i32) {
    %c0_i32 = arith.constant 0 : i32
    %c0_i32_0 = arith.constant 0 : i32
    %c0_i32_1 = arith.constant 0 : i32
    return %c0_i32, %c0_i32_0 : i32, i32
  }
  func.func @transform_2(%arg0: i32) -> (i32, i32) {
    %c0_i32 = arith.constant 0 : i32
    %c0_i32_0 = arith.constant 0 : i32
    %c0_i32_1 = arith.constant 0 : i32
    return %c0_i32, %c0_i32_0 : i32, i32
  }
  func.func @transform_3(%arg0: i32) -> (i32, i32) {
    %c0_i32 = arith.constant 0 : i32
    %c0_i32_0 = arith.constant 0 : i32
    %c0_i32_1 = arith.constant 0 : i32
    return %c0_i32, %c0_i32_0 : i32, i32
  }
  func.func @transform_4(%arg0: i32) -> (i32, i32) {
    %c0_i32 = arith.constant 0 : i32
    %c0_i32_0 = arith.constant 0 : i32
    %c0_i32_1 = arith.constant 0 : i32
    return %c0_i32, %c0_i32_0 : i32, i32
  }
  func.func @transform_5(%arg0: i32) -> (i32, i32) {
    %c0_i32 = arith.constant 0 : i32
    %c0_i32_0 = arith.constant 0 : i32
    %c0_i32_1 = arith.constant 0 : i32
    return %c0_i32, %c0_i32_0 : i32, i32
  }
  func.func @transform_6(%arg0: i32) -> (i32, i32) {
    %c0_i32 = arith.constant 0 : i32
    %c0_i32_0 = arith.constant 0 : i32
    %c0_i32_1 = arith.constant 0 : i32
    return %c0_i32, %c0_i32_0 : i32, i32
  }
  func.func @transform_7(%arg0: i32) -> (i32, i32) {
    %c0_i32 = arith.constant 0 : i32
    %c0_i32_0 = arith.constant 0 : i32
    return %arg0, %c0_i32 : i32, i32
  }
}

</mosaic_0001>

<bundles_post_ra>
// kernel: _forward_impl.1
= control target key start
LH: loop header
LB: loop body
LE: loop exit
PB: predicated region body
PF: predicated region fallthrough
CT: control target
= control target key end

     0   :  { %v469_v0 = vmov 0.0   ;;  %vm470_vm0 = vmmov 0   ;;  %vm49_vm1 = vcmask 130048   ;;  %vm324_vm2 = vcmask 31744   ;;  %s606_s1 = inlined_call_operand.vmem [shape: bf16[16,128], index: 1, kind: input, shape index: {}]   ;;  %s607_s0 = inlined_call_operand.vmem [shape: bf16[16,16], index: 0, kind: input, shape index: {}]   ;;  %s608_s3 = inlined_call_operand.vmem [shape: bf16[128,128], index: 3, kind: input, shape index: {}]   ;;  %s609_s5 = inlined_call_operand.vmem [shape: bf16[128,4], index: 5, kind: input, shape index: {}]   ;;  %s610_s2 = inlined_call_operand.vmem [shape: f32[1,128], index: 2, kind: input, shape index: {}]   ;;  %s611_s4 = inlined_call_operand.vmem [shape: f32[1,128], index: 4, kind: input, shape index: {}]   ;;  %s612_s6 = inlined_call_operand.vmem [shape: f32[1,4], index: 6, kind: input, shape index: {}]   ;;  %s613_s7 = inlined_call_operand.vmem [shape: f32[16,4], index: 7, kind: output, shape index: {}]  }
   0x1   :  { %395 = vmatprep.subr.bf16.mxu0 %v469_v0  ;;  %v443_v1 = vld [vmem:[%s606_s1] sm:$0xff]   ;;  %397 = vmatprep.mubr.msk.bf16.mxu0 %vm470_vm0, %v469_v0  ;;  %v445_v3 = vld [vmem:[%s608_s3 + $0x38] sm:$0xff]   ;;  %v446_v4 = vld [vmem:[%s608_s3 + $0x30] sm:$0xff]  }
   0x2   :  { %v444_v2 = vld [vmem:[%s607_s0] sm:$0xff]   ;;  %401 = vmatprep.subr.bf16.mxu1 %v469_v0  ;;  %417 = vmatprep.mubr.msk.bf16.mxu1 %vm470_vm0, %v469_v0  ;;  %v447_v5 = vld [vmem:[%s608_s3 + $0x28] sm:$0xff]   ;;  %v449_v7 = vld [vmem:[%s608_s3 + $0x18] sm:$0xff]  }
   0x3   :  { %396 = vmatpush3.bf16.msra.mxu0 %v443_v1  ;;  %402 = vmatpush3.bf16.msra.mxu1 %v445_v3  ;;  %v448_v6 = vld [vmem:[%s608_s3 + $0x20] sm:$0xff]   ;;  %v450_v8 = vld [vmem:[%s608_s3 + $0x10] sm:$0xff]   ;;  %v451_v9 = vld [vmem:[%s608_s3 + $0x8] sm:$0xff]  }
   0x4   :  { %421 = vmatprep.subr.bf16.mxu0 %v469_v0  ;;  %403 = vmatprep.subr.bf16.mxu1 %v469_v0  ;;  %v452_v10 = vld [vmem:[%s608_s3] sm:$0xff]   ;;  %v453_v11 = vld [vmem:[%s609_s5 + $0x38] sm:$0xff]   ;;  %v454_v12 = vld [vmem:[%s609_s5 + $0x30] sm:$0xff]  }
   0x5   :  { %v455_v13 = vld [vmem:[%s609_s5 + $0x28] sm:$0xff]   ;;  %v456_v14 = vld [vmem:[%s609_s5 + $0x20] sm:$0xff]   ;;  %v457_v15 = vld [vmem:[%s609_s5 + $0x18] sm:$0xff]  }
   0x6   :  { %398 = vmatmul.mubr.msk.bf16.vlgmr.msra.gmra.mxu0 %vm49_vm1, %v444_v2  ;;  %v353_v16 = vld [vmem:[%s610_s2] ss:$0 sm:$0xff]  ;;  %v458_v26 = vld [vmem:[%s609_s5 + $0x10] sm:$0xff]   ;;  %v459_v27 = vld [vmem:[%s609_s5 + $0x8] sm:$0xff]  }
   0x7   :  { %437 = vmatprep.mubr.msk.bf16.mxu0 %vm470_vm0, %v469_v0  ;;  %404 = vmatpush3.bf16.msra.mxu1 %v446_v4  ;;  %v460_v28 = vld [vmem:[%s609_s5] sm:$0xff]  }
   0x8   :  { %405 = vmatprep.subr.bf16.mxu1 %v469_v0  ;;  %422 = vmatpush3.bf16.msra.mxu0 %v453_v11  ;;  %v357_v29 = vld [vmem:[%s611_s4] ss:$0 sm:$0xff] }
   0x9   :  { %423 = vmatprep.subr.bf16.mxu0 %v469_v0  ;;  %v366_v39 = vld [vmem:[%s612_s6] ss:$0 sm:$0xff] }
   0xb   :  { %406 = vmatpush3.bf16.msra.mxu1 %v447_v5 }
   0xc   :  { %407 = vmatprep.subr.bf16.mxu1 %v469_v0  ;;  %424 = vmatpush3.bf16.msra.mxu0 %v454_v12 }
   0xd   :  { %425 = vmatprep.subr.bf16.mxu0 %v469_v0 }
   0xf   :  { %408 = vmatpush3.bf16.msra.mxu1 %v448_v6 }
  0x10   :  { %409 = vmatprep.subr.bf16.mxu1 %v469_v0  ;;  %426 = vmatpush3.bf16.msra.mxu0 %v455_v13 }
  0x11   :  { %427 = vmatprep.subr.bf16.mxu0 %v469_v0 }
  0x13   :  { %410 = vmatpush3.bf16.msra.mxu1 %v449_v7 }
  0x14   :  { %411 = vmatprep.subr.bf16.mxu1 %v469_v0  ;;  %428 = vmatpush3.bf16.msra.mxu0 %v456_v14 }
  0x15   :  { %429 = vmatprep.subr.bf16.mxu0 %v469_v0 }
  0x17   :  { %412 = vmatpush3.bf16.msra.mxu1 %v450_v8 }
  0x18   :  { %413 = vmatprep.subr.bf16.mxu1 %v469_v0  ;;  %430 = vmatpush3.bf16.msra.mxu0 %v457_v15 }
  0x19   :  { %431 = vmatprep.subr.bf16.mxu0 %v469_v0 }
  0x1b   :  { %414 = vmatpush3.bf16.msra.mxu1 %v451_v9 }
  0x1c   :  { %415 = vmatprep.subr.bf16.mxu1 %v469_v0  ;;  %432 = vmatpush3.bf16.msra.mxu0 %v458_v26 }
  0x1d   :  { %433 = vmatprep.subr.bf16.mxu0 %v469_v0 }
  0x1f   :  { %416 = vmatpush3.bf16.msra.mxu1 %v452_v10 }
  0x20   :  { %434 = vmatpush3.bf16.msra.mxu0 %v459_v27 }
  0x21   :  { %435 = vmatprep.subr.bf16.mxu0 %v469_v0 }
  0x24   :  { %436 = vmatpush3.bf16.msra.mxu0 %v460_v28 }
  0xc6   :  { %v87_v17 = vpop.f32.mrf.mxu0 }
  0xc7   :  { %v88_v19 = vadd.f32 %v353_v16, %v87_v17 }
  0xc8   :  { %v399_v18 = vpop.f32.mrf.mxu0 }
  0xc9   :  { %v94_v23 = vmax.f32 %v88_v19, 0.0 }
  0xca   :  { %v90_v20 = vpop.f32.mrf.mxu0 }
  0xcb   :  { %v91_v21 = vadd.f32 %v353_v16, %v90_v20 }
  0xcc   :  { %v400_v22 = vpop.f32.mrf.mxu0 }
  0xcd   :  { %v95_v24 = vmax.f32 %v91_v21, 0.0 }
  0xcf   :  { %v96_v25 = vpack.c.bf16 %v95_v24, %v94_v23 }
  0xd1   :  { %418 = vmatmul.mubr.bf16.vlgmr.msra.gmra.mxu1 %v96_v25 }
 0x191   :  { %v202_v30 = vpop.f32.mrf.mxu1 }
 0x192   :  { %v203_v32 = vadd.f32 %v357_v29, %v202_v30 }
 0x193   :  { %v419_v31 = vpop.f32.mrf.mxu1 }
 0x194   :  { %v209_v36 = vmax.f32 %v203_v32, 0.0 }
 0x195   :  { %v205_v33 = vpop.f32.mrf.mxu1 }
 0x196   :  { %v206_v34 = vadd.f32 %v357_v29, %v205_v33 }
 0x197   :  { %v420_v35 = vpop.f32.mrf.mxu1 }
 0x198   :  { %v210_v37 = vmax.f32 %v206_v34, 0.0 }
 0x19a   :  { %v211_v38 = vpack.c.bf16 %v210_v37, %v209_v36 }
 0x19c   :  { %438 = vmatmul.mubr.bf16.vlgmr.msra.gmra.mxu0 %v211_v38 }
 0x25c   :  { %v317_v40 = vpop.f32.mrf.mxu0 }
 0x25d   :  { %v318_v41 = vadd.f32 %v366_v39, %v317_v40 }
 0x25e   :  { %v439_v42 = vpop.f32.mrf.mxu0 }
 0x25f   :  { %v325_v43 = vsel %vm324_vm2, %v318_v41, -inf }
 0x260   :  { %326 = vmax.xlane.f32.xlu0 %v325_v43  ;;  %v320_v44 = vpop.f32.mrf.mxu0 }
 0x261   :  { %v321_v45 = vadd.f32 %v366_v39, %v320_v44 }
 0x262   :  { %v440_v46 = vpop.f32.mrf.mxu0 }
 0x263   :  { %v328_v47 = vsel %vm324_vm2, %v321_v45, -inf }
 0x264   :  { %329 = vmax.xlane.f32.xlu0 %v328_v47 }
 0x2e9   :  { %v327_v48 = vpop.xlane.xlu0 %326 }
 0x2ea   :  { %v331_v49 = vsub.f32 %v318_v41, %v327_v48 }
 0x2ec   :  { %v333_v50 = vmul.f32 1.442695, %v331_v49 }
 0x2ed   :  { %v330_v51 = vpop.xlane.xlu0 %329 }
 0x2ee   :  { %461 = vpow2.f32 %v333_v50  ;;  %v332_v52 = vsub.f32 %v321_v45, %v330_v51 }
 0x2f0   :  { %v335_v53 = vmul.f32 1.442695, %v332_v52 }
 0x2f2   :  { %463 = vpow2.f32 %v335_v53 }
 0x2fb   :  { %v462_v54 = vpop.eup %461 }
 0x2fc   :  { %v337_v55 = vsel %vm324_vm2, %v462_v54, 0.0 }
 0x2fd   :  { %338 = vadd.xlane.f32.xlu1 %v337_v55 }
 0x2ff   :  { %v464_v56 = vpop.eup %463 }
 0x300   :  { %v340_v57 = vsel %vm324_vm2, %v464_v56, 0.0 }
 0x301   :  { %341 = vadd.xlane.f32.xlu1 %v340_v57 }
 0x386   :  { %v339_v58 = vpop.xlane.xlu1 %338 }
 0x387   :  { %465 = vrcp.f32 %v339_v58 }
 0x38a   :  { %v342_v59 = vpop.xlane.xlu1 %341 }
 0x38b   :  { %467 = vrcp.f32 %v342_v59 }
 0x394   :  { %v466_v60 = vpop.eup %465 }
 0x395   :  { %v344_v61 = vmul.f32 %v466_v60, %v462_v54 }
 0x397   :  { %347 = vst.msk [vmem:[%s613_s7] sm:$0xff] %vm324_vm2, %v344_v61 }
 0x398   :  { %v468_v62 = vpop.eup %467 }
 0x399   :  { %v346_v63 = vmul.f32 %v468_v62, %v464_v56 }
 0x39b   :  { %348 = vst.msk [vmem:[%s613_s7 + $0x8] sm:$0xff] %vm324_vm2, %v346_v63 }

</bundles_post_ra>
